<compile_context>
chip_gen: v6e
topology: v6e:2x2x1
jax: 0.10.0
libtpu: 0.0.40
codegen_flags: <defaults>
</compile_context>

<pallas_src>
import jax
import jax.numpy as jnp
from jax.experimental import pallas as pl
from jax.experimental.pallas import tpu as pltpu


def _cdiv(a, b):
    return -(-a // b)


def _round_up(a, b):
    return _cdiv(a, b) * b


# --------------------------- Pallas kernel ----------------------------------

def _mlp_kernel(x_ref, w1_ref, b1_ref, w2_ref, b2_ref, o_ref):
    # x_ref: (nz, TL)   w1_ref: (nh, nz)   b1_ref: (nh, 1)
    # w2_ref: (nc, nh)  b2_ref: (nc, 1)    o_ref: (nc, TL)
    x = x_ref[...].astype(jnp.float32)                       # cast after DMA, in-kernel
    h = jnp.dot(w1_ref[...], x, preferred_element_type=jnp.float32) + b1_ref[...]
    h = jnp.maximum(h, 0.0)                                   # ReLU
    y = jnp.dot(w2_ref[...], h, preferred_element_type=jnp.float32) + b2_ref[...]
    o_ref[...] = y.astype(o_ref.dtype)


# --------------------------- wrapper -----------------------------------------

def th_generator_forward(x, params, *, tl=16384):
    """ThGenerator forward pass. x: (..., nz) -> (M, nc)."""
    w1, b1, w2, b2 = params["w1"], params["b1"], params["w2"], params["b2"]
    nh, nz = w1.shape          # PyTorch convention: (out_features, in_features)
    nc = w2.shape[0]

    x2d = x.reshape(-1, nz)    # keep caller dtype; f32 cast happens inside the kernel
    m = x2d.shape[0]

    # Choose a lane tile (multiple of 128).  Split the work as evenly as possible
    # and keep >= 2 grid steps when there is enough work (v7x has 2 TensorCores).
    m128 = _round_up(max(m, 1), 128)
    num_steps = _cdiv(m128, tl)
    if num_steps < 2 and m128 >= 2048:
        num_steps = 2
    tl_eff = _round_up(_cdiv(m128, num_steps), 128)
    m_pad = tl_eff * num_steps

    # Lane-dense layout: batch on lanes.  The pad fuses into this transpose, so
    # there is no separate full HBM pad pass.
    xt = jnp.pad(x2d, ((0, m_pad - m), (0, 0))).T            # (nz, m_pad)

    out_t = pl.pallas_call(
        _mlp_kernel,
        out_shape=jax.ShapeDtypeStruct((nc, m_pad), jnp.float32),
        grid_spec=pltpu.PrefetchScalarGridSpec(
            num_scalar_prefetch=0,
            grid=(num_steps,),
            in_specs=[
                pl.BlockSpec((nz, tl_eff), lambda i: (0, i)),   # streamed activations
                pl.BlockSpec((nh, nz), lambda i: (0, 0)),       # resident weights/biases
                pl.BlockSpec((nh, 1), lambda i: (0, 0)),
                pl.BlockSpec((nc, nh), lambda i: (0, 0)),
                pl.BlockSpec((nc, 1), lambda i: (0, 0)),
            ],
            out_specs=pl.BlockSpec((nc, tl_eff), lambda i: (0, i)),
        ),
        compiler_params=pltpu.CompilerParams(
            dimension_semantics=("parallel",)),
    )(xt, w1, b1.reshape(nh, 1), w2, b2.reshape(nc, 1))

    # The tail slice fuses into the output transpose (layout plumbing only).
    return out_t[:, :m].T                                      # (m, nc)


# --------------------------- parameters (PyTorch Linear init) ----------------

def init_params(key, nz=4, nc=6):
    ks = jax.random.split(key, 4)
    nh = 13

    def lin(kw, kb, fan_in, fan_out):
        bound = 1.0 / jnp.sqrt(fan_in)
        # PyTorch nn.Linear convention: weight is (out_features, in_features)
        w = jax.random.uniform(kw, (fan_out, fan_in), jnp.float32, -bound, bound)
        b = jax.random.uniform(kb, (fan_out,), jnp.float32, -bound, bound)
        return w, b

    w1, b1 = lin(ks[0], ks[1], nz, nh)
    w2, b2 = lin(ks[2], ks[3], nh, nc)
    return dict(w1=w1, b1=b1, w2=w2, b2=b2)


# --------------------------- pure-JAX reference ------------------------------

def reference_forward(x, params):
    nz = params["w1"].shape[1]
    nc = params["w2"].shape[0]
    x2d = x.reshape(-1, nz)
    h = jnp.maximum(x2d @ params["w1"].T + params["b1"], 0.0)
    y = h @ params["w2"].T + params["b2"]
    return y.reshape(-1, nc)


# --------------------------- main ---------------------------------------------

if __name__ == "__main__":
    key = jax.random.PRNGKey(0)
    nz, nc = 4, 6

    kx, kx2, kp = jax.random.split(key, 3)
    params = init_params(kp, nz=nz, nc=nc)

    # Small shape consistent with the module (single lane block).
    x = jax.random.normal(kx, (8, nz), jnp.float32)
    out = jax.block_until_ready(th_generator_forward(x, params))
    assert out.shape == (8, nc), out.shape
    ref = jax.block_until_ready(reference_forward(x, params))
    err = float(jnp.max(jnp.abs(out - ref)))
    assert jnp.allclose(out, ref, atol=1e-5, rtol=1e-5), err

    # Exercise the multi-block (grid >= 2) and padded-tail path (still small).
    x2 = jax.random.normal(kx2, (2500, nz), jnp.float32)
    out2 = jax.block_until_ready(th_generator_forward(x2, params))
    assert out2.shape == (2500, nc), out2.shape
    ref2 = jax.block_until_ready(reference_forward(x2, params))
    err2 = float(jnp.max(jnp.abs(out2 - ref2)))
    assert jnp.allclose(out2, ref2, atol=1e-5, rtol=1e-5), err2

    print("KERNEL_OK")
</pallas_src>

<mosaic_0001>
module attributes {stable_mosaic.version = 11 : i64} {
  func.func @_mlp_kernel(%arg0: i32, %arg1: memref<4x128xf32, #tpu.memory_space<vmem>>, %arg2: memref<13x4xf32, #tpu.memory_space<vmem>>, %arg3: memref<13x1xf32, #tpu.memory_space<vmem>>, %arg4: memref<6x13xf32, #tpu.memory_space<vmem>>, %arg5: memref<6x1xf32, #tpu.memory_space<vmem>>, %arg6: memref<6x128xf32, #tpu.memory_space<vmem>>) attributes {dimension_semantics = [#tpu.dimension_semantics<parallel>], iteration_bounds = array<i64: 1>, scalar_prefetch = 0 : i64, scratch_operands = 0 : i64, tpu.core_type = #tpu.core_type<tc>, window_params = [{transform_indices = @transform_0, window_bounds = array<i64: 4, 128>}, {pipeline_mode = #tpu.pipeline_mode<synchronous>, transform_indices = @transform_1, window_bounds = array<i64: 13, 4>}, {pipeline_mode = #tpu.pipeline_mode<synchronous>, transform_indices = @transform_2, window_bounds = array<i64: 13, 1>}, {pipeline_mode = #tpu.pipeline_mode<synchronous>, transform_indices = @transform_3, window_bounds = array<i64: 6, 13>}, {pipeline_mode = #tpu.pipeline_mode<synchronous>, transform_indices = @transform_4, window_bounds = array<i64: 6, 1>}, {transform_indices = @transform_5, window_bounds = array<i64: 6, 128>}]} {
    %c0 = arith.constant 0 : index
    %c0_0 = arith.constant 0 : index
    %0 = vector.load %arg1[%c0, %c0_0] : memref<4x128xf32, #tpu.memory_space<vmem>>, vector<4x128xf32>
    %c0_1 = arith.constant 0 : index
    %c0_2 = arith.constant 0 : index
    %1 = vector.load %arg2[%c0_1, %c0_2] : memref<13x4xf32, #tpu.memory_space<vmem>>, vector<13x4xf32>
    %cst = arith.constant dense<0.000000e+00> : vector<13x128xf32>
    %2 = tpu.matmul %1, %0, %cst {dimension_numbers = #tpu.dot_dimension_numbers<[1], [0], [0], [1], [0, 0, 1, 1], [], []>} : vector<13x4xf32>, vector<4x128xf32>, vector<13x128xf32> -> vector<13x128xf32>
    %c0_3 = arith.constant 0 : index
    %c0_4 = arith.constant 0 : index
    %3 = vector.load %arg3[%c0_3, %c0_4] : memref<13x1xf32, #tpu.memory_space<vmem>>, vector<13x1xf32>
    %4 = vector.broadcast %3 : vector<13x1xf32> to vector<13x128xf32>
    %5 = arith.addf %2, %4 : vector<13x128xf32>
    %cst_5 = arith.constant 0.000000e+00 : f32
    %6 = vector.broadcast %cst_5 : f32 to vector<13x128xf32>
    %7 = arith.maximumf %5, %6 : vector<13x128xf32>
    %c0_6 = arith.constant 0 : index
    %c0_7 = arith.constant 0 : index
    %8 = vector.load %arg4[%c0_6, %c0_7] : memref<6x13xf32, #tpu.memory_space<vmem>>, vector<6x13xf32>
    %cst_8 = arith.constant dense<0.000000e+00> : vector<6x128xf32>
    %9 = tpu.matmul %8, %7, %cst_8 {dimension_numbers = #tpu.dot_dimension_numbers<[1], [0], [0], [1], [0, 0, 1, 1], [], []>} : vector<6x13xf32>, vector<13x128xf32>, vector<6x128xf32> -> vector<6x128xf32>
    %c0_9 = arith.constant 0 : index
    %c0_10 = arith.constant 0 : index
    %10 = vector.load %arg5[%c0_9, %c0_10] : memref<6x1xf32, #tpu.memory_space<vmem>>, vector<6x1xf32>
    %11 = vector.broadcast %10 : vector<6x1xf32> to vector<6x128xf32>
    %12 = arith.addf %9, %11 : vector<6x128xf32>
    %c0_11 = arith.constant 0 : index
    %c0_12 = arith.constant 0 : index
    %13 = vector.load %arg6[%c0_11, %c0_12] : memref<6x128xf32, #tpu.memory_space<vmem>>, vector<6x128xf32>
    tpu.vector_store %arg6[%c0_11, %c0_12], %12 {strides = array<i32>} : memref<6x128xf32, #tpu.memory_space<vmem>>, vector<6x128xf32>,
    return
  }
  func.func @transform_0(%arg0: i32) -> (i32, i32) {
    %c0_i32 = arith.constant 0 : i32
    %c0_i32_0 = arith.constant 0 : i32
    return %c0_i32, %arg0 : i32, i32
  }
  func.func @transform_1(%arg0: i32) -> (i32, i32) {
    %c0_i32 = arith.constant 0 : i32
    %c0_i32_0 = arith.constant 0 : i32
    %c0_i32_1 = arith.constant 0 : i32
    return %c0_i32, %c0_i32_0 : i32, i32
  }
  func.func @transform_2(%arg0: i32) -> (i32, i32) {
    %c0_i32 = arith.constant 0 : i32
    %c0_i32_0 = arith.constant 0 : i32
    %c0_i32_1 = arith.constant 0 : i32
    return %c0_i32, %c0_i32_0 : i32, i32
  }
  func.func @transform_3(%arg0: i32) -> (i32, i32) {
    %c0_i32 = arith.constant 0 : i32
    %c0_i32_0 = arith.constant 0 : i32
    %c0_i32_1 = arith.constant 0 : i32
    return %c0_i32, %c0_i32_0 : i32, i32
  }
  func.func @transform_4(%arg0: i32) -> (i32, i32) {
    %c0_i32 = arith.constant 0 : i32
    %c0_i32_0 = arith.constant 0 : i32
    %c0_i32_1 = arith.constant 0 : i32
    return %c0_i32, %c0_i32_0 : i32, i32
  }
  func.func @transform_5(%arg0: i32) -> (i32, i32) {
    %c0_i32 = arith.constant 0 : i32
    %c0_i32_0 = arith.constant 0 : i32
    return %c0_i32, %arg0 : i32, i32
  }
}

</mosaic_0001>

<bundles_post_ra>
// kernel: tpu_custom_call.1
= control target key start
LH: loop header
LB: loop body
LE: loop exit
PB: predicated region body
PF: predicated region fallthrough
CT: control target
= control target key end

     0   :  { %vm43_vm0 = vcmask 1043456   ;;  %vm36_vm1 = vcmask 31744   ;;  %v275_v4 = vmov 0   ;;  %s333_s0 = inlined_call_operand.vmem [shape: f32[4,128], index: 0, kind: input, shape index: {}]   ;;  %s334_s1 = inlined_call_operand.vmem [shape: f32[13,4], index: 1, kind: input, shape index: {}]   ;;  %s335_s2 = inlined_call_operand.vmem [shape: f32[13,1], index: 2, kind: input, shape index: {}]   ;;  %s336_s3 = inlined_call_operand.vmem [shape: f32[6,13], index: 3, kind: input, shape index: {}]   ;;  %s337_s4 = inlined_call_operand.vmem [shape: f32[6,1], index: 4, kind: input, shape index: {}]   ;;  %s338_s5 = inlined_call_operand.hbm [shape: f32[6,128], index: 5, kind: output, shape index: {}]  }
   0x1   :  { %v21_v0 = vld [vmem:[%s333_s0] sm:$0xf]  ;;  %v23_v2 = vld [vmem:[%s334_s1 + $0x8] sm:$0x1f]  ;;  %251 = vset.pattern.permute.xlu0 %v275_v4 }
   0x2   :  { %v22_v1 = vld [vmem:[%s334_s1] sm:$0xff]  ;;  %235 = vmatprep.subr.msk.mxu0 %vm43_vm0, %v21_v0  ;;  %v25_v3 = vld [vmem:[%s335_s2 + $0x8] sm:$0x1f] }
   0x3   :  { %237 = vmatprep.mubr.msk.f32.mxu0 %vm36_vm1, %v22_v1  ;;  %236 = vmatpush3.msk.msra.mxu0 %vm43_vm0, %v21_v0 }
   0x4   :  { %10 = vsyncpa [#allocation3], 0  ;;  %238 = vmatmul.mubr.msk.f32.vlgmr.msra.gmra.mxu0 %vm36_vm1, %v23_v2  ;;  %33 = vperm.xlu0 %251, %v25_v3   ;;  %v24_v5 = vld [vmem:[%s335_s2] sm:$0xff]  ;;  %v276_v6 = vmov 0.0   ;;  %vm277_vm2 = vmmov 0   ;;  %vm135_vm3 = vcmask 1044480  }
   0x5   :  { %252 = vset.pattern.permute.xlu1 %v275_v4  ;;  %240 = vmatprep.subr.mxu1 %v276_v6  ;;  %v125_v7 = vld [vmem:[%s337_s4] sm:$0x3f]  ;;  %vm131_vm4 = vcmask 105472   ;;  %s278_s4 = smov [#allocation2]  }
   0x6   :  { %244 = vmatprep.mubr.msk.f32.mxu1 %vm277_vm2, %v276_v6  ;;  %128 = vperm.xlu1 %252, %v125_v7   ;;  %v124_v16 = vld [vmem:[%s336_s3] sm:$0x3f]  ;;  %s216_s29 = sshll.u32 %s278_s4, 4  ;;  %s217_s29 = int_to_ptr.vmem [resolvable:$true] %s216_s29 }
   0x7   :  { %s253_s30 = scalar_lea.vmem %s217_s29, 128  ;;  %p258_p1 = scmp.lt.s32.totalorder %s217_s29, %s217_s29 }
   0x8   :  { %28 = vperm.xlu0 %251, %v24_v5   ;;  %p254_p0 = scmp.ne.s32.totalorder %s217_s29, %s253_s30  ;;  %p259_p2 = scmp.lt.s32.totalorder %s253_s30, %s253_s30 }
   0xa   :  { %p260_p3 = por %p259_p2, %p258_p1 }
   0xc   :  { %p261_p4 = pnand %p260_p3, %p254_p0 }
  0x7f   :  { %v34_v8 = vpop.permute.xlu0 %33 }
  0x81   :  { %v129_v17 = vpop.permute.xlu1 %128 }
  0x83   :  { %v29_v11 = vpop.permute.xlu0 %28 }
  0xc4   :  { %v239_v9 = vpop.f32.mrf.mxu0 }
  0xc5   :  { %v119_v10 = vadd.f32 %v239_v9, %v34_v8 }
  0xc6   :  { %v113_v12 = vpop.f32.mrf.mxu0 }
  0xc7   :  { %v123_v13 = vmax.f32 %v119_v10, 0.0  ;;  %v114_v14 = vadd.f32 %v113_v12, %v29_v11 }
  0xc9   :  { %v122_v15 = vmax.f32 %v114_v14, 0.0  ;;  %241 = vmatpush3.msk.msra.mxu1 %vm135_vm3, %v123_v13 }
  0xca   :  { %242 = vmatprep.subr.mxu1 %v276_v6 }
  0xcb   :  { %243 = vmatpush3.msra.mxu1 %v122_v15 }
  0xcc   :  { %245 = vmatmul.mubr.msk.f32.vlgmr.msra.gmra.mxu1 %vm131_vm4, %v124_v16 }
 0x18c   :  { %v205_v18 = vpop.f32.mrf.mxu1 }
 0x18d   :  { %v206_v19 = vadd.f32 %v205_v18, %v129_v17 }
 0x18e   :  { %v246_v20 = vpop.f32.mrf.mxu1 }
 0x18f   :  { %209 = vst [vmem:[#allocation2] sm:$0x3f] %v206_v19 }
 0x190   :  { %264 = shalt.err (!%p261_p4)
}
 0x191   :  { %219 = dma.vmem_to_hbm [thread:$0]  %s217_s29, 128, %s338_s5, [#allocation3]  }
 0x192   :  { %273 = dma.done.wait [#allocation3], 128  }
 0x193   :  { %274 = vsyncadd [#allocation3], 4294967168 }
 0x194   :  { %223 = vsyncpa [#allocation3], 1 }

</bundles_post_ra>
